<compile_context>
chip_gen: v6e
topology: v6e:2x2x1
jax: 0.10.0
libtpu: 0.0.40
codegen_flags: <defaults>
</compile_context>

<pallas_src>
import functools

import jax
import jax.numpy as jnp
import numpy as np
from jax.experimental import pallas as pl
from jax.experimental.pallas import tpu as pltpu


def _cbs_block_kernel(block_cat_ref, block_img_ref, block_nrows_ref,
                      img_ref, txt_ref, out_ref, *, threshold, bank_resident):
    # block_img_ref is only consumed by the img index_map.
    del block_img_ref
    g = pl.program_id(0)
    nvalid = block_nrows_ref[g]

    @pl.when(nvalid > 0)
    def _():
        # ---- image rows of this block, L2-normalized in f32 (rsqrt/EUP) ----
        # Zero (padding) rows stay exactly zero -> contribute nothing below.
        img = img_ref[...].astype(jnp.float32)                    # (TB, D)
        ssq = jnp.sum(img * img, axis=-1, keepdims=True)          # (TB, 1)
        img = img * jax.lax.rsqrt(jnp.maximum(ssq, 1e-12))

        if bank_resident:
            # whole normalized bank lives in VMEM; dynamic first-axis index
            txt = txt_ref[block_cat_ref[g]]                       # (D, Tpad)
        else:
            txt = txt_ref[0]                                      # (D, Tpad)

        # ---- cosine similarities: one dense MXU matmul per block -----------
        x = jnp.dot(img.astype(txt.dtype), txt,
                    preferred_element_type=jnp.float32)           # (TB, Tpad)

        # ---- fused threshold; pad rows / pad prompts give x == 0 -----------
        x = jnp.where(x > threshold, x, 0.0)
        # guard -log(1-x) against x >= 1 (the torch code would produce inf)
        x = jnp.minimum(x, 1.0 - 1e-6)
        # negation hoisted: row-sum log(1-x), negate the (1, Tpad) result once
        out_ref[...] = (-jnp.sum(jnp.log(1.0 - x), axis=0,
                                 keepdims=True))[None]

    @pl.when(nvalid == 0)
    def _():
        # dead / empty-prompt block: skip matmul + log chain, write zeros
        out_ref[...] = jnp.zeros_like(out_ref)


def cbs_loss_with_label(image_features, text_bank, labels, counts,
                        threshold=0.24, block_rows=128,
                        compute_dtype=jnp.bfloat16,
                        bank_resident=None, vmem_limit_bytes=None):
    """Pallas implementation of BackgroundSuppressionLossWithLabel.forward.

    image_features: (B, D)   precomputed CLIP image features
    text_bank:      (C, T, D) per-category background prompt features
    labels:         (B, C)   one-hot labels
    counts:         (C,)     #valid prompts per category (0 == skip category)
    block_rows:     samples per grid step sharing one category; default 128
                    (use 256 on v6e/v7x, keep 128 on v5e's 4x128 MXU)
    compute_dtype:  matmul operand / img_g storage dtype (bf16 default for
                    throughput; pass jnp.float32 to match the reference tight)
    bank_resident:  keep the whole normalized text bank VMEM-resident
                    (None = auto when the bank is <= 8 MiB)
    vmem_limit_bytes: raise the scoped-VMEM limit (needed on v5e's 16 MiB
                    default for large resident banks or TB >= 256)
    """
    B, D = image_features.shape
    C, T, D2 = text_bank.shape
    assert D == D2
    TB = int(block_rows)
    min_rows = 16 if jnp.dtype(compute_dtype).itemsize < 4 else 8
    assert TB % min_rows == 0, (
        f"block_rows={TB} must be a multiple of {min_rows} for "
        f"{jnp.dtype(compute_dtype).name}")
    LANES = 128
    Tpad = ((T + LANES - 1) // LANES) * LANES       # lane-dense prompt axis

    cat_idx = jnp.argmax(labels, axis=1).astype(jnp.int32)
    counts = counts.astype(jnp.int32)

    # ---- pre-normalize text bank ONCE; zero invalid / padded prompt rows ----
    tb32 = text_bank.astype(jnp.float32)
    tssq = jnp.sum(tb32 * tb32, axis=-1, keepdims=True)
    txt_n = tb32 * jax.lax.rsqrt(jnp.maximum(tssq, 1e-12))        # (C, T, D)
    prompt_ids = jnp.arange(T, dtype=jnp.int32)[None, :, None]
    txt_n = jnp.where(prompt_ids < counts[:, None, None], txt_n, 0.0)
    txt_n = jnp.pad(txt_n, ((0, 0), (0, Tpad - T), (0, 0)))       # (C, Tpad, D)
    txt_n = jnp.transpose(txt_n, (0, 2, 1)).astype(compute_dtype)  # (C, D, Tpad)

    if bank_resident is None:
        bank_bytes = C * D * Tpad * jnp.dtype(compute_dtype).itemsize
        bank_resident = bank_bytes <= 8 * 1024 * 1024
    bank_resident = bool(bank_resident)

    # ---- MoE-style routing: sort by category, pad each group to TB rows -----
    NB = pl.cdiv(B, TB) + C                       # static upper bound on blocks
    order = jnp.argsort(cat_idx).astype(jnp.int32)
    sorted_cat = cat_idx[order]
    cnt_b = jnp.zeros((C,), jnp.int32).at[cat_idx].add(1)         # samples/cat
    blocks_per_cat = (cnt_b + TB - 1) // TB
    cum_blocks = jnp.cumsum(blocks_per_cat)
    n_used = cum_blocks[-1]                        # #really used blocks (>= 1)
    blk_start = jnp.concatenate(
        [jnp.zeros((1,), jnp.int32), cum_blocks[:-1]])
    grp_start = jnp.concatenate(
        [jnp.zeros((1,), jnp.int32), jnp.cumsum(cnt_b)[:-1]])
    rank = jnp.arange(B, dtype=jnp.int32) - grp_start[sorted_cat]
    dest = blk_start[sorted_cat] * TB + rank                      # padded row id

    # routed image slab in the compute dtype (bf16 -> half the HBM traffic)
    row_src = jnp.full((NB * TB,), -1, jnp.int32).at[dest].set(order)
    gathered = image_features[jnp.clip(row_src, 0, B - 1)].astype(compute_dtype)
    img_g = jnp.where(row_src[:, None] >= 0, gathered,
                      jnp.zeros_like(gathered))                   # (NB*TB, D)

    # per-block metadata (SMEM scalar prefetch):
    grid_ids = jnp.arange(NB, dtype=jnp.int32)
    g_eff = jnp.minimum(grid_ids, jnp.maximum(n_used - 1, 0))
    block_cat = jnp.clip(
        jnp.searchsorted(cum_blocks, g_eff, side="right"), 0, C - 1
    ).astype(jnp.int32)                                           # category/block
    block_img = g_eff.astype(jnp.int32)                           # dedup dead DMAs
    block_nrows = jnp.zeros((NB,), jnp.int32).at[dest // TB].add(1)
    # skip blocks whose category has an empty background-prompt list
    block_nrows = jnp.where(counts[block_cat] > 0, block_nrows, 0)

    if bank_resident:
        # whole bank un-blocked: fetched once, stays VMEM-resident
        txt_spec = pl.BlockSpec((C, D, Tpad), lambda g, bc, bi, bn: (0, 0, 0))
    else:
        # data-dependent text slab for block g's category (deduped by the sort)
        txt_spec = pl.BlockSpec((1, D, Tpad), lambda g, bc, bi, bn: (bc[g], 0, 0))

    cp_kwargs = dict(dimension_semantics=("parallel",))  # megacore OK on v7x
    if vmem_limit_bytes is not None:
        cp_kwargs["vmem_limit_bytes"] = int(vmem_limit_bytes)

    out = pl.pallas_call(
        functools.partial(_cbs_block_kernel, threshold=float(threshold),
                          bank_resident=bank_resident),
        out_shape=jax.ShapeDtypeStruct((NB, 1, Tpad), jnp.float32),
        grid_spec=pltpu.PrefetchScalarGridSpec(
            num_scalar_prefetch=3,                # block_cat/img/nrows -> SMEM
            grid=(NB,),
            in_specs=[
                # image rows of block g (dead blocks remap -> DMA deduped)
                pl.BlockSpec((TB, D), lambda g, bc, bi, bn: (bi[g], 0)),
                txt_spec,
            ],
            out_specs=pl.BlockSpec((1, 1, Tpad), lambda g, bc, bi, bn: (g, 0, 0)),
        ),
        compiler_params=pltpu.CompilerParams(**cp_kwargs),
    )(block_cat, block_img, block_nrows, img_g, txt_n)

    return jnp.sum(out)


def ref_loss(image_features, text_bank, labels, counts, threshold=0.24):
    """Pure-JAX reference mirroring the PyTorch forward."""
    cat_idx = jnp.argmax(labels, axis=1)
    total = jnp.float32(0.0)
    for i in range(image_features.shape[0]):
        img = image_features[i].reshape(1, -1)
        img = img / jnp.linalg.norm(img, axis=-1, keepdims=True)
        txt = text_bank[cat_idx[i]]
        txt = txt / jnp.linalg.norm(txt, axis=-1, keepdims=True)
        x = img @ txt.T                                           # (1, T)
        x = jnp.where(x > threshold, x, jnp.zeros_like(x))
        mask = jnp.arange(txt.shape[0]) < counts[cat_idx[i]]
        x = jnp.where(mask[None, :], x, jnp.zeros_like(x))
        total = total + jnp.sum(-jnp.log(1.0 - x))
    return total


if __name__ == "__main__":
    B, C, T, D = 2, 4, 8, 32   # batch, categories, prompts/category, feat dim
    key = jax.random.PRNGKey(0)
    k1, k2, k3 = jax.random.split(key, 3)

    # "encoded" CLIP features (deterministic, synthetic)
    image_features = jax.random.normal(k1, (B, D), dtype=jnp.float32)
    text_bank = jax.random.normal(k2, (C, T, D), dtype=jnp.float32)

    # one-hot labels (single foreground class per image, as in the torch code)
    label_ids = jax.random.randint(k3, (B,), 0, C)
    labels = jax.nn.one_hot(label_ids, C, dtype=jnp.float32)

    # variable-length prompt lists per category (0 == category missing -> skip)
    counts = jnp.array([T, 5, 0, T], dtype=jnp.int32)

    expected = ref_loss(image_features, text_bank, labels, counts,
                        threshold=0.24)

    # 1) f32 operands, streamed text bank — bit-tight check vs the reference
    loss_f32 = cbs_loss_with_label(image_features, text_bank, labels, counts,
                                   threshold=0.24, block_rows=128,
                                   compute_dtype=jnp.float32,
                                   bank_resident=False)
    loss_f32 = jax.block_until_ready(loss_f32)
    np.testing.assert_allclose(np.asarray(loss_f32), np.asarray(expected),
                               rtol=1e-4, atol=1e-4)

    # 2) production defaults: bf16 operands/img slab, VMEM-resident bank.
    #    bf16 similarities can flip terms sitting exactly at the threshold,
    #    so only a ballpark check here (f32 path above is the tight one).
    loss_bf16 = cbs_loss_with_label(image_features, text_bank, labels, counts,
                                    threshold=0.24)
    loss_bf16 = jax.block_until_ready(loss_bf16)
    assert np.isfinite(np.asarray(loss_bf16))
    assert abs(float(loss_bf16) - float(expected)) < 1.0

    print("KERNEL_OK")
</pallas_src>

<mosaic_0001>
module attributes {stable_mosaic.version = 11 : i64} {
  func.func @_cbs_block_kernel(%arg0: i32, %arg1: memref<5xi32, #tpu.memory_space<smem>>, %arg2: memref<5xi32, #tpu.memory_space<smem>>, %arg3: memref<5xi32, #tpu.memory_space<smem>>, %arg4: memref<128x32xf32, #tpu.memory_space<vmem>>, %arg5: memref<1x32x128xf32, #tpu.memory_space<vmem>>, %arg6: memref<1x1x128xf32, #tpu.memory_space<vmem>>) attributes {dimension_semantics = [#tpu.dimension_semantics<parallel>], iteration_bounds = array<i64: 5>, scalar_prefetch = 3 : i64, scratch_operands = 0 : i64, tpu.core_type = #tpu.core_type<tc>, window_params = [{transform_indices = @transform_0, window_bounds = array<i64: 128, 32>}, {transform_indices = @transform_1, window_bounds = array<i64: 1, 32, 128>}, {transform_indices = @transform_2, window_bounds = array<i64: 1, 1, 128>}]} {
    %0 = arith.index_cast %arg0 : i32 to index
    %1 = memref.load %arg3[%0] : memref<5xi32, #tpu.memory_space<smem>>
    %c0_i32 = arith.constant 0 : i32
    %2 = arith.cmpi sgt, %1, %c0_i32 : i32
    %3 = arith.extui %2 : i1 to i32
    %c0_i32_0 = arith.constant 0 : i32
    %4 = arith.cmpi ne, %3, %c0_i32_0 : i32
    scf.if %4 {
      %c0 = arith.constant 0 : index
      %c0_3 = arith.constant 0 : index
      %8 = vector.load %arg4[%c0, %c0_3] : memref<128x32xf32, #tpu.memory_space<vmem>>, vector<128x32xf32>
      %9 = arith.mulf %8, %8 : vector<128x32xf32>
      %cst = arith.constant dense<0.000000e+00> : vector<128xf32>
      %10 = vector.multi_reduction <add>, %9, %cst [1] : vector<128x32xf32> to vector<128xf32>
      %11 = vector.shape_cast %10 : vector<128xf32> to vector<128x1xf32>
      %cst_4 = arith.constant 9.99999996E-13 : f32
      %12 = vector.broadcast %cst_4 : f32 to vector<128x1xf32>
      %13 = arith.maximumf %11, %12 : vector<128x1xf32>
      %14 = math.rsqrt %13 : vector<128x1xf32>
      %15 = vector.broadcast %14 : vector<128x1xf32> to vector<128x32xf32>
      %16 = arith.mulf %8, %15 : vector<128x32xf32>
      %c0_5 = arith.constant 0 : index
      %c0_6 = arith.constant 0 : index
      %c0_7 = arith.constant 0 : index
      %17 = vector.load %arg5[%c0_5, %c0_6, %c0_7] : memref<1x32x128xf32, #tpu.memory_space<vmem>>, vector<1x32x128xf32>
      %18 = vector.shape_cast %17 : vector<1x32x128xf32> to vector<32x128xf32>
      %cst_8 = arith.constant dense<0.000000e+00> : vector<128x128xf32>
      %19 = tpu.matmul %16, %18, %cst_8 {dimension_numbers = #tpu.dot_dimension_numbers<[1], [0], [0], [1], [0, 0, 1, 1], [], []>} : vector<128x32xf32>, vector<32x128xf32>, vector<128x128xf32> -> vector<128x128xf32>
      %cst_9 = arith.constant 2.400000e-01 : f32
      %20 = vector.broadcast %cst_9 : f32 to vector<128x128xf32>
      %21 = arith.cmpf ogt, %19, %20 : vector<128x128xf32>
      %cst_10 = arith.constant 0.000000e+00 : f32
      %22 = vector.broadcast %cst_10 : f32 to vector<128x128xf32>
      %23 = arith.select %21, %19, %22 : vector<128x128xi1>, vector<128x128xf32>
      %cst_11 = arith.constant 0.999998986 : f32
      %24 = vector.broadcast %cst_11 : f32 to vector<128x128xf32>
      %25 = arith.minimumf %23, %24 : vector<128x128xf32>
      %cst_12 = arith.constant 1.000000e+00 : f32
      %26 = vector.broadcast %cst_12 : f32 to vector<128x128xf32>
      %27 = arith.subf %26, %25 : vector<128x128xf32>
      %28 = math.log %27 : vector<128x128xf32>
      %cst_13 = arith.constant dense<0.000000e+00> : vector<128xf32>
      %29 = vector.multi_reduction <add>, %28, %cst_13 [0] : vector<128x128xf32> to vector<128xf32>
      %30 = vector.shape_cast %29 : vector<128xf32> to vector<1x128xf32>
      %cst_14 = arith.constant 0.000000e+00 : f32
      %31 = vector.broadcast %cst_14 : f32 to vector<1x128xf32>
      %32 = arith.subf %31, %30 : vector<1x128xf32>
      %33 = vector.shape_cast %32 : vector<1x128xf32> to vector<1x1x128xf32>
      %c0_15 = arith.constant 0 : index
      %c0_16 = arith.constant 0 : index
      %c0_17 = arith.constant 0 : index
      %34 = vector.load %arg6[%c0_15, %c0_16, %c0_17] : memref<1x1x128xf32, #tpu.memory_space<vmem>>, vector<1x1x128xf32>
      tpu.vector_store %arg6[%c0_15, %c0_16, %c0_17], %33 {strides = array<i32>} : memref<1x1x128xf32, #tpu.memory_space<vmem>>, vector<1x1x128xf32>,
    } else {
    }
    %c0_i32_1 = arith.constant 0 : i32
    %5 = arith.cmpi eq, %1, %c0_i32_1 : i32
    %6 = arith.extui %5 : i1 to i32
    %c0_i32_2 = arith.constant 0 : i32
    %7 = arith.cmpi ne, %6, %c0_i32_2 : i32
    scf.if %7 {
      %cst = arith.constant 0.000000e+00 : f32
      %8 = vector.broadcast %cst : f32 to vector<1x1x128xf32>
      %c0 = arith.constant 0 : index
      %c0_3 = arith.constant 0 : index
      %c0_4 = arith.constant 0 : index
      %9 = vector.load %arg6[%c0, %c0_3, %c0_4] : memref<1x1x128xf32, #tpu.memory_space<vmem>>, vector<1x1x128xf32>
      tpu.vector_store %arg6[%c0, %c0_3, %c0_4], %8 {strides = array<i32>} : memref<1x1x128xf32, #tpu.memory_space<vmem>>, vector<1x1x128xf32>,
    } else {
    }
    return
  }
  func.func @transform_0(%arg0: i32, %arg1: memref<5xi32, #tpu.memory_space<smem>>, %arg2: memref<5xi32, #tpu.memory_space<smem>>, %arg3: memref<5xi32, #tpu.memory_space<smem>>) -> (i32, i32) {
    %0 = arith.index_cast %arg0 : i32 to index
    %1 = memref.load %arg2[%0] : memref<5xi32, #tpu.memory_space<smem>>
    %c0_i32 = arith.constant 0 : i32
    %c0_i32_0 = arith.constant 0 : i32
    return %1, %c0_i32 : i32, i32
  }
  func.func @transform_1(%arg0: i32, %arg1: memref<5xi32, #tpu.memory_space<smem>>, %arg2: memref<5xi32, #tpu.memory_space<smem>>, %arg3: memref<5xi32, #tpu.memory_space<smem>>) -> (i32, i32, i32) {
    %0 = arith.index_cast %arg0 : i32 to index
    %1 = memref.load %arg1[%0] : memref<5xi32, #tpu.memory_space<smem>>
    %c0_i32 = arith.constant 0 : i32
    %c0_i32_0 = arith.constant 0 : i32
    %c0_i32_1 = arith.constant 0 : i32
    return %1, %c0_i32, %c0_i32_0 : i32, i32, i32
  }
  func.func @transform_2(%arg0: i32, %arg1: memref<5xi32, #tpu.memory_space<smem>>, %arg2: memref<5xi32, #tpu.memory_space<smem>>, %arg3: memref<5xi32, #tpu.memory_space<smem>>) -> (i32, i32, i32) {
    %c0_i32 = arith.constant 0 : i32
    %c0_i32_0 = arith.constant 0 : i32
    %c0_i32_1 = arith.constant 0 : i32
    return %arg0, %c0_i32, %c0_i32_0 : i32, i32, i32
  }
}

</mosaic_0001>

<bundles_post_ra>
// kernel: tpu_custom_call.1
= control target key start
LH: loop header
LB: loop body
LE: loop exit
PB: predicated region body
PF: predicated region fallthrough
CT: control target
= control target key end

     0   :  { %s1310_s0 = inlined_call_operand.vmem [shape: s32[5], index: 0, kind: input, shape index: {}]   ;;  %s1311_s3 = inlined_call_operand.vmem [shape: f32[640,32], index: 3, kind: input, shape index: {}]   ;;  %s1312_s4 = inlined_call_operand.vmem [shape: f32[4,32,128], index: 4, kind: input, shape index: {}]   ;;  %s1313_s5 = inlined_call_operand.hbm [shape: f32[5,1,128], index: 5, kind: output, shape index: {}]   ;;  %s1314_s1 = inlined_call_operand.vmem [shape: s32[5], index: 1, kind: input, shape index: {}]   ;;  %s1315_s2 = inlined_call_operand.vmem [shape: s32[5], index: 2, kind: input, shape index: {}]  }
   0x1   :  { %s10_s20 = sshll.u32 %s1310_s0, 4  ;;  %s14_s23 = sshll.u32 %s1314_s1, 4  ;;  %s11_s20 = int_to_ptr.vmem [resolvable:$true] %s10_s20  ;;  %s15_s23 = int_to_ptr.vmem [resolvable:$true] %s14_s23 }
   0x2   :  { %s926_s24 = scalar_lea.vmem %s11_s20, 16  ;;  %p931_p1 = scmp.lt.s32.totalorder %s11_s20, %s11_s20 }
   0x3   :  { %p927_p0 = scmp.ne.s32.totalorder %s11_s20, %s926_s24  ;;  %p932_p2 = scmp.lt.s32.totalorder %s926_s24, %s926_s24 }
   0x5   :  { %p933_p3 = por %p932_p2, %p931_p1 }
   0x7   :  { %p934_p4 = pnand %p933_p3, %p927_p0 }
   0x9   :  { %937 = shalt.err (!%p934_p4)  }
   0xa   :  { %s1026_s25 = smov [#allocation3]   ;;  %s938_s26 = scalar_lea.vmem %s15_s23, 16 }
   0xb   :  { %13 = dma.vmem_to_smem %s11_s20, 16, %s1026_s25, [#allocation2] }
   0xc   :  { %p939_p5 = scmp.ne.s32.totalorder %s15_s23, %s938_s26  ;;  %p943_p6 = scmp.lt.s32.totalorder %s15_s23, %s15_s23 }
   0xd   :  { %p944_p7 = scmp.lt.s32.totalorder %s938_s26, %s938_s26 }
   0xf   :  { %p945_p8 = por %p944_p7, %p943_p6 }
  0x11   :  { %p946_p9 = pnand %p945_p8, %p939_p5 }
  0x13   :  { %949 = shalt.err (!%p946_p9)  }
  0x14   :  { %s1027_s0 = smov [#allocation4]   ;;  %s18_s28 = sshll.u32 %s1315_s2, 4  ;;  %s19_s28 = int_to_ptr.vmem [resolvable:$true] %s18_s28 }
  0x15   :  { %17 = dma.vmem_to_smem %s15_s23, 16, %s1027_s0, [#allocation2] }
  0x16   :  { %s950_s29 = scalar_lea.vmem %s19_s28, 16  ;;  %p955_p11 = scmp.lt.s32.totalorder %s19_s28, %s19_s28 }
  0x17   :  { %p951_p10 = scmp.ne.s32.totalorder %s19_s28, %s950_s29  ;;  %p956_p12 = scmp.lt.s32.totalorder %s950_s29, %s950_s29 }
  0x19   :  { %p957_p13 = por %p956_p12, %p955_p11 }
  0x1b   :  { %p958_p0 = pnand %p957_p13, %p951_p10 }
  0x1d   :  { %961 = shalt.err (!%p958_p0)  }
  0x1e   :  { %s1028_s30 = smov [#allocation5]  }
  0x1f   :  { %21 = dma.vmem_to_smem %s19_s28, 16, %s1028_s30, [#allocation2] }
  0x20   :  { %1004 = dma.done.wait [#allocation2], 48 }
  0x21   :  { %1005 = vsyncadd [#allocation2], 4294967248 }
  0x22   :  { %23 = sfence }
  0x23   :  { %24 = vsyncpa [#allocation7], 0 }
  0x24   :  { %26 = vsyncpa [#allocation7 + $0x1], 0  ;;  %s1070_s6 = smov 0   ;;  %s1072_s7 = smov 0  }
  0x25   :  { %s1074_s2 = smov 0   ;;  %s1076_s8 = smov 0  }
  0x26 LB: > { %s1091_s9 = sadd.s32 4294967295, %s1024_s8   ;;  %s729_s10 = sadd.s32 4294967294, %s1024_s8   ;;  %s1024_s8 = sphi %s1076_s8, %s1321_s8   ;;  %s1020_s2 = sphi %s1074_s2, %s1320_s2   ;;  %s1016_s7 = sphi %s1072_s7, %s1319_s7   ;;  %s1012_s6 = sphi %s1070_s6, %s1318_s6  }
  0x27   : > { %s1095_s11 = sadd.s32 1, %s1024_s8   ;;  %s95_s12 = sadd.s32 1, %s1020_s2 }
  0x28   : > { %s92_s13 = ssub.s32 %s1024_s8, %s1095_s11  ;;  %p105_p1 = scmp.ne.s32.totalorder %s1020_s2, %s1016_s7 }
  0x29   : > { %p93_p2 = scmp.eq.s32.totalorder %s92_s13, 0  ;;  %p106_p3 = scmp.eq.s32.totalorder %s1091_s9, 4 }
  0x2a   : > { %p111_p4 = scmp.ne.s32.totalorder %s1016_s7, %s1012_s6  ;;  %p112_p5 = scmp.eq.s32.totalorder %s729_s10, 4 }
  0x2b   : > { %s1106_s14 = scalar_select %p93_p2, %s1020_s2, %s95_s12  }
  0x2c   : > { %p1108_p6 = por %p106_p3, %p105_p1  ;;  %p1112_p7 = por %p112_p5, %p111_p4 }
  0x2d   : > { %p732_p8 = scmp.ge.s32.totalorder %s1024_s8, 1  ;;  %p151_p9 = scmp.lt.s32.totalorder %s1024_s8, 6 }
  0x2f   : > { %p152_p10 = pnand %p732_p8, %p151_p9 }
  0x30   : > { %s177_s17 = sand.u32 (!%p152_p10), 1, %s1016_s7   ;;  %s179_s18 = sld [smem:[#allocation4 + %s1091_s9]] (!%p152_p10) }
  0x31   : > { %155 = sbr.rel (%p152_p10) target bundleno = 526 (0x20e), region = 28  ;;  %s187_s19 = sld [smem:[#allocation3 + %s1091_s9]] (!%p152_p10) }
  0x32   : > { %s1122_s20 = sld [smem:[#allocation5 + %s1091_s9]] (!%p152_p10)  ;;  %s1136_s28 = scalar_lea.vmem (!%p152_p10), [#allocation6], %s177_s17 }
  0x36   : > { %s733_s21 = sshll.u32 %s179_s18, 4 }
  0x37   : > { %p181_p11 = scmp.lt.s32.totalorder %s733_s21, 79  ;;  %p188_p12 = scmp.lt.s32.totalorder %s187_s19, 3 }
  0x38   : > { %p737_p13 = scmp.le.s32.totalorder %s1122_s20, 0 }
  0x39   : > { %s1323_s21 = smov (!%p181_p11, %s733_s21), 79  ;;  %s1325_s19 = smov (!%p188_p12, %s187_s19), 3 }
  0x3a   : > { %s734_s22 = sshll.u32 %s1323_s21, 3  ;;  %s758_s26 = sshll.u32 %s1325_s19, 5 }
  0x3b   : > { %s1127_s25 = scalar_lea.vmem %s1311_s3, %s734_s22  ;;  %s1132_s27 = scalar_lea.vmem %s1312_s4, %s758_s26 }
  0x3c   : > { %198 = sbr.rel (%p737_p13) target bundleno = 494 (0x1ee), region = 32 }
  0x41   : > { %v1140_v0 = vld [vmem:[%s1127_s25] sm:$0xff]  ;;  %vm231_vm0 = vcmask 261120   ;;  %v1143_v1 = vld [vmem:[%s1127_s25 + $0x10] sm:$0xff]  ;;  %v1146_v2 = vld [vmem:[%s1127_s25 + $0x8] sm:$0xff] }
  0x42   : > { %v215_v3 = vmul.f32 %v1140_v0, %v1140_v0  ;;  %v217_v4 = vmul.f32 %v1143_v1, %v1143_v1  ;;  %v216_v5 = vmul.f32 %v1146_v2, %v1146_v2  ;;  %v1155_v6 = vld [vmem:[%s1127_s25 + $0x18] sm:$0xff]  ;;  %v1160_v8 = vld [vmem:[%s1127_s25 + $0x20] sm:$0xff]  ;;  %v1163_v9 = vld [vmem:[%s1127_s25 + $0x28] sm:$0xff] }
  0x43   : > { %v218_v7 = vmul.f32 %v1155_v6, %v1155_v6  ;;  %v219_v14 = vmul.f32 %v1160_v8, %v1160_v8  ;;  %v220_v15 = vmul.f32 %v1163_v9, %v1163_v9  ;;  %v1174_v16 = vld [vmem:[%s1127_s25 + $0x30] sm:$0xff]  ;;  %v1177_v17 = vld [vmem:[%s1127_s25 + $0x38] sm:$0xff]  ;;  %v1186_v22 = vld [vmem:[%s1127_s25 + $0x40] sm:$0xff] }
  0x44   : > { %v232_v10 = vsel %vm231_vm0, %v215_v3, 0.0  ;;  %v238_v11 = vsel %vm231_vm0, %v217_v4, 0.0  ;;  %v235_v12 = vsel %vm231_vm0, %v216_v5, 0.0  ;;  %v221_v20 = vmul.f32 %v1174_v16, %v1174_v16  ;;  %v1189_v23 = vld [vmem:[%s1127_s25 + $0x48] sm:$0xff]  ;;  %v1198_v28 = vld [vmem:[%s1127_s25 + $0x50] sm:$0xff]  ;;  %v1201_v29 = vld [vmem:[%s1127_s25 + $0x58] sm:$0xff] }
  0x45   : > { %233 = vadd.xlane.f32.xlu0 %v232_v10  ;;  %239 = vadd.xlane.f32.xlu1 %v238_v11  ;;  %v241_v13 = vsel %vm231_vm0, %v218_v7, 0.0  ;;  %v244_v18 = vsel %vm231_vm0, %v219_v14, 0.0  ;;  %v247_v19 = vsel %vm231_vm0, %v220_v15, 0.0  ;;  %v222_v21 = vmul.f32 %v1177_v17, %v1177_v17  ;;  %v1210_v34 = vld [vmem:[%s1127_s25 + $0x60] sm:$0xff]  ;;  %v1213_v35 = vld [vmem:[%s1127_s25 + $0x68] sm:$0xff]  ;;  %v1222_v40 = vld [vmem:[%s1127_s25 + $0x70] sm:$0xff] }
  0x46   : > { %v250_v24 = vsel %vm231_vm0, %v221_v20, 0.0  ;;  %v223_v26 = vmul.f32 %v1186_v22, %v1186_v22  ;;  %v224_v27 = vmul.f32 %v1189_v23, %v1189_v23  ;;  %v225_v32 = vmul.f32 %v1198_v28, %v1198_v28  ;;  %v1225_v41 = vld [vmem:[%s1127_s25 + $0x78] sm:$0xff]  ;;  %v330_v49 = vld [vmem:[%s1132_s27 + $0x10] sm:$0xff]  ;;  %v329_v50 = vld [vmem:[%s1132_s27 + $0x8] sm:$0xff] }
  0x47   : > { %v253_v25 = vsel %vm231_vm0, %v222_v21, 0.0  ;;  %v226_v33 = vmul.f32 %v1201_v29, %v1201_v29  ;;  %v227_v38 = vmul.f32 %v1210_v34, %v1210_v34  ;;  %v228_v39 = vmul.f32 %v1213_v35, %v1213_v35  ;;  %v331_v46 = vld [vmem:[%s1132_s27 + $0x18] sm:$0xff]  ;;  %v328_v51 = vld [vmem:[%s1132_s27] sm:$0xff] }
  0x48   : > { %v256_v30 = vsel %vm231_vm0, %v223_v26, 0.0  ;;  %v259_v31 = vsel %vm231_vm0, %v224_v27, 0.0  ;;  %v262_v36 = vsel %vm231_vm0, %v225_v32, 0.0  ;;  %v229_v44 = vmul.f32 %v1222_v40, %v1222_v40  ;;  %779 = vmatprep.subr.mxu0 %v331_v46  ;;  %811 = vmatprep.subr.mxu1 %v331_v46 }
  0x49   : > { %236 = vadd.xlane.f32.xlu0 %v235_v12  ;;  %242 = vadd.xlane.f32.xlu1 %v241_v13  ;;  %v265_v37 = vsel %vm231_vm0, %v226_v33, 0.0  ;;  %v268_v42 = vsel %vm231_vm0, %v227_v38, 0.0  ;;  %v271_v43 = vsel %vm231_vm0, %v228_v39, 0.0  ;;  %v230_v45 = vmul.f32 %v1225_v41, %v1225_v41 }
  0x4a   : > { %v274_v47 = vsel %vm231_vm0, %v229_v44, 0.0  ;;  %780 = vmatpush3.msra.mxu0 %v331_v46  ;;  %815 = vmatpush3.msra.mxu1 %v331_v46 }
  0x4b   : > { %v277_v48 = vsel %vm231_vm0, %v230_v45, 0.0  ;;  %781 = vmatprep.subr.mxu0 %v330_v49  ;;  %812 = vmatprep.subr.mxu1 %v330_v49 }
  0x4c   : > { %782 = vmatpush3.msra.mxu0 %v330_v49  ;;  %816 = vmatpush3.msra.mxu1 %v330_v49 }
  0x4d   : > { %245 = vadd.xlane.f32.xlu0 %v244_v18  ;;  %248 = vadd.xlane.f32.xlu1 %v247_v19 }
  0x4e   : > { %783 = vmatprep.subr.mxu0 %v329_v50  ;;  %813 = vmatprep.subr.mxu1 %v329_v50 }
  0x4f   : > { %784 = vmatpush3.msra.mxu0 %v329_v50  ;;  %817 = vmatpush3.msra.mxu1 %v329_v50 }
  0x50   : > { %785 = vmatprep.subr.mxu0 %v328_v51  ;;  %814 = vmatprep.subr.mxu1 %v328_v51 }
  0x51   : > { %251 = vadd.xlane.f32.xlu0 %v250_v24  ;;  %254 = vadd.xlane.f32.xlu1 %v253_v25 }
  0x52   : > { %786 = vmatpush3.msra.mxu0 %v328_v51  ;;  %818 = vmatpush3.msra.mxu1 %v328_v51 }
  0x55   : > { %257 = vadd.xlane.f32.xlu0 %v256_v30  ;;  %260 = vadd.xlane.f32.xlu1 %v259_v31 }
  0x59   : > { %263 = vadd.xlane.f32.xlu0 %v262_v36  ;;  %266 = vadd.xlane.f32.xlu1 %v265_v37 }
  0x5d   : > { %269 = vadd.xlane.f32.xlu0 %v268_v42  ;;  %272 = vadd.xlane.f32.xlu1 %v271_v43 }
  0x61   : > { %275 = vadd.xlane.f32.xlu0 %v274_v47  ;;  %278 = vadd.xlane.f32.xlu1 %v277_v48 }
  0xce   : > { %v234_v52 = vpop.xlane.xlu0 %233  ;;  %v240_v53 = vpop.xlane.xlu1 %239 }
  0xcf   : > { %v280_v54 = vmax.f32 %v234_v52, 1e-12  ;;  %v282_v55 = vmax.f32 %v240_v53, 1e-12 }
  0xd1   : > { %862 = vrsqrt.f32 %v280_v54 }
  0xd2   : > { %864 = vrsqrt.f32 %v282_v55  ;;  %v237_v56 = vpop.xlane.xlu0 %236  ;;  %v243_v57 = vpop.xlane.xlu1 %242 }
  0xd3   : > { %v281_v58 = vmax.f32 %v237_v56, 1e-12  ;;  %v283_v59 = vmax.f32 %v243_v57, 1e-12 }
  0xd5   : > { %866 = vrsqrt.f32 %v281_v58 }
  0xd6   : > { %868 = vrsqrt.f32 %v283_v59  ;;  %v246_v60 = vpop.xlane.xlu0 %245  ;;  %v249_v61 = vpop.xlane.xlu1 %248 }
  0xd7   : > { %v284_v62 = vmax.f32 %v246_v60, 1e-12  ;;  %v285_v63 = vmax.f32 %v249_v61, 1e-12 }
  0xd9   : > { %870 = vrsqrt.f32 %v284_v62 }
  0xda   : > { %872 = vrsqrt.f32 %v285_v63  ;;  %v252_v3 = vpop.xlane.xlu0 %251  ;;  %v255_v4 = vpop.xlane.xlu1 %254 }
  0xdb   : > { %v286_v5 = vmax.f32 %v252_v3, 1e-12  ;;  %v287_v7 = vmax.f32 %v255_v4, 1e-12 }
  0xdd   : > { %874 = vrsqrt.f32 %v286_v5 }
  0xde   : > { %v863_v10 = vpop.eup %862  ;;  %876 = vrsqrt.f32 %v287_v7  ;;  %v258_v11 = vpop.xlane.xlu0 %257 }
  0xdf   : > { %v261_v12 = vpop.xlane.xlu1 %260  ;;  %v865_v13 = vpop.eup %864  ;;  %v288_v14 = vmax.f32 %v258_v11, 1e-12  ;;  %v312_v18 = vmul.f32 %v863_v10, %v1140_v0 }
  0xe0   : > { %v289_v15 = vmax.f32 %v261_v12, 1e-12  ;;  %v314_v24 = vmul.f32 %v865_v13, %v1143_v1 }
  0xe1   : > { %878 = vrsqrt.f32 %v288_v14  ;;  %787 = vmatprep.mubr.msk.f32.mxu0 %vm231_vm0, %v312_v18 }
  0xe2   : > { %v867_v19 = vpop.eup %866  ;;  %880 = vrsqrt.f32 %v289_v15  ;;  %v264_v20 = vpop.xlane.xlu0 %263 }
  0xe3   : > { %v267_v21 = vpop.xlane.xlu1 %266  ;;  %v869_v25 = vpop.eup %868  ;;  %v290_v26 = vmax.f32 %v264_v20, 1e-12  ;;  %v313_v30 = vmul.f32 %v867_v19, %v1146_v2 }
  0xe4   : > { %v291_v27 = vmax.f32 %v267_v21, 1e-12  ;;  %v315_v31 = vmul.f32 %v869_v25, %v1155_v6 }
  0xe5   : > { %882 = vrsqrt.f32 %v290_v26  ;;  %788 = vmatmul.mubr.msk.f32.vlgmr.msra.gmra.mxu0 %vm231_vm0, %v313_v30 }
  0xe6   : > { %v871_v0 = vpop.eup %870  ;;  %884 = vrsqrt.f32 %v291_v27  ;;  %790 = vmatprep.mubr.msk.f32.mxu0 %vm231_vm0, %v314_v24  ;;  %v270_v32 = vpop.xlane.xlu0 %269 }
  0xe7   : > { %v273_v33 = vpop.xlane.xlu1 %272  ;;  %v873_v36 = vpop.eup %872  ;;  %v292_v37 = vmax.f32 %v270_v32, 1e-12  ;;  %v316_v1 = vmul.f32 %v871_v0, %v1160_v8 }
  0xe8   : > { %v293_v38 = vmax.f32 %v273_v33, 1e-12  ;;  %v317_v2 = vmul.f32 %v873_v36, %v1163_v9 }
  0xe9   : > { %886 = vrsqrt.f32 %v292_v37  ;;  %791 = vmatmul.mubr.msk.f32.gmra.mxu0 %vm231_vm0, %v315_v31 }
  0xea   : > { %v875_v39 = vpop.eup %874  ;;  %888 = vrsqrt.f32 %v293_v38  ;;  %v276_v42 = vpop.xlane.xlu0 %275  ;;  %793 = vmatprep.mubr.msk.f32.mxu0 %vm231_vm0, %v316_v1 }
  0xeb   : > { %v279_v6 = vpop.xlane.xlu1 %278  ;;  %v877_v43 = vpop.eup %876  ;;  %v294_v44 = vmax.f32 %v276_v42, 1e-12  ;;  %v318_v46 = vmul.f32 %v875_v39, %v1174_v16 }
  0xec   : > { %v295_v45 = vmax.f32 %v279_v6, 1e-12  ;;  %v319_v8 = vmul.f32 %v877_v43, %v1177_v17 }
  0xed   : > { %890 = vrsqrt.f32 %v294_v44  ;;  %794 = vmatmul.mubr.msk.f32.gmra.mxu0 %vm231_vm0, %v317_v2 }
  0xee   : > { %v879_v47 = vpop.eup %878  ;;  %892 = vrsqrt.f32 %v295_v45  ;;  %796 = vmatprep.mubr.msk.f32.mxu0 %vm231_vm0, %v318_v46 }
  0xef   : > { %v881_v9 = vpop.eup %880  ;;  %v320_v48 = vmul.f32 %v879_v47, %v1186_v22 }
  0xf0   : > { %v321_v49 = vmul.f32 %v881_v9, %v1189_v23 }
  0xf1   : > { %797 = vmatmul.mubr.msk.f32.gmra.mxu0 %vm231_vm0, %v319_v8  ;;  %799 = vmatprep.mubr.msk.f32.mxu1 %vm231_vm0, %v320_v48 }
  0xf2   : > { %v883_v50 = vpop.eup %882  ;;  %800 = vmatmul.mubr.msk.f32.vlgmr.msra.gmra.mxu1 %vm231_vm0, %v321_v49 }
  0xf3   : > { %v885_v16 = vpop.eup %884  ;;  %v322_v51 = vmul.f32 %v883_v50, %v1198_v28 }
  0xf4   : > { %v323_v17 = vmul.f32 %v885_v16, %v1201_v29 }
  0xf5   : > { %802 = vmatprep.mubr.msk.f32.mxu1 %vm231_vm0, %v322_v51 }
  0xf6   : > { %v887_v52 = vpop.eup %886  ;;  %803 = vmatmul.mubr.msk.f32.gmra.mxu1 %vm231_vm0, %v323_v17 }
  0xf7   : > { %v889_v22 = vpop.eup %888  ;;  %v324_v23 = vmul.f32 %v887_v52, %v1210_v34 }
  0xf8   : > { %v325_v53 = vmul.f32 %v889_v22, %v1213_v35 }
  0xf9   : > { %805 = vmatprep.mubr.msk.f32.mxu1 %vm231_vm0, %v324_v23 }
  0xfa   : > { %v891_v54 = vpop.eup %890  ;;  %806 = vmatmul.mubr.msk.f32.gmra.mxu1 %vm231_vm0, %v325_v53 }
  0xfb   : > { %v893_v55 = vpop.eup %892  ;;  %v326_v28 = vmul.f32 %v891_v54, %v1222_v40 }
  0xfc   : > { %v327_v29 = vmul.f32 %v893_v55, %v1225_v41 }
  0xfd   : > { %808 = vmatprep.mubr.msk.f32.mxu1 %vm231_vm0, %v326_v28 }
  0xfe   : > { %809 = vmatmul.mubr.msk.f32.gmra.mxu1 %vm231_vm0, %v327_v29 }
 0x1a5   : > { %v789_v56 = vpop.f32.mrf.mxu0 }
 0x1a6   : > { %vm526_vm1 = vcmp.gt.f32.partialorder %v789_v56, 0.24 }
 0x1a7   : > { %v542_v57 = vsel %vm526_vm1, %v789_v56, 0.0  ;;  %v446_v34 = vpop.f32.mrf.mxu0 }
 0x1a8   : > { %v558_v58 = vmin.f32 %v542_v57, 0.999999  ;;  %vm525_vm2 = vcmp.gt.f32.partialorder %v446_v34, 0.24 }
 0x1a9   : > { %v541_v35 = vsel %vm525_vm2, %v446_v34, 0.0  ;;  %v792_v59 = vpop.f32.mrf.mxu0 }
 0x1aa   : > { %v574_v60 = vsub.f32 1.0, %v558_v58  ;;  %v557_v61 = vmin.f32 %v541_v35, 0.999999  ;;  %vm528_vm3 = vcmp.gt.f32.partialorder %v792_v59, 0.24 }
 0x1ab   : > { %v544_v62 = vsel %vm528_vm3, %v792_v59, 0.0  ;;  %v456_v63 = vpop.f32.mrf.mxu0 }
 0x1ac   : > { %v573_v40 = vsub.f32 1.0, %v557_v61  ;;  %v560_v3 = vmin.f32 %v544_v62, 0.999999  ;;  %vm527_vm4 = vcmp.gt.f32.partialorder %v456_v63, 0.24  ;;  %894 = vlog2.f32 %v574_v60 }
 0x1ad   : > { %v543_v41 = vsel %vm527_vm4, %v456_v63, 0.0  ;;  %v795_v4 = vpop.f32.mrf.mxu0 }
 0x1ae   : > { %896 = vlog2.f32 %v573_v40  ;;  %v576_v5 = vsub.f32 1.0, %v560_v3  ;;  %v559_v7 = vmin.f32 %v543_v41, 0.999999  ;;  %vm530_vm5 = vcmp.gt.f32.partialorder %v795_v4, 0.24 }
 0x1af   : > { %v546_v10 = vsel %vm530_vm5, %v795_v4, 0.0  ;;  %v466_v11 = vpop.f32.mrf.mxu0 }
 0x1b0   : > { %v575_v12 = vsub.f32 1.0, %v559_v7  ;;  %v562_v13 = vmin.f32 %v546_v10, 0.999999  ;;  %vm529_vm6 = vcmp.gt.f32.partialorder %v466_v11, 0.24  ;;  %898 = vlog2.f32 %v576_v5 }
 0x1b1   : > { %v545_v14 = vsel %vm529_vm6, %v466_v11, 0.0  ;;  %v798_v15 = vpop.f32.mrf.mxu0 }
 0x1b2   : > { %900 = vlog2.f32 %v575_v12  ;;  %v578_v18 = vsub.f32 1.0, %v562_v13  ;;  %v561_v19 = vmin.f32 %v545_v14, 0.999999  ;;  %vm532_vm7 = vcmp.gt.f32.partialorder %v798_v15, 0.24  ;;  %v801_v20 = vpop.f32.mrf.mxu1 }
 0x1b3   : > { %v548_v21 = vsel %vm532_vm7, %v798_v15, 0.0  ;;  %vm534_vm8 = vcmp.gt.f32.partialorder %v801_v20, 0.24  ;;  %v476_v24 = vpop.f32.mrf.mxu0 }
 0x1b4   : > { %v577_v25 = vsub.f32 1.0, %v561_v19  ;;  %v564_v26 = vmin.f32 %v548_v21, 0.999999  ;;  %v550_v27 = vsel %vm534_vm8, %v801_v20, 0.0  ;;  %v486_v30 = vpop.f32.mrf.mxu1  ;;  %902 = vlog2.f32 %v578_v18 }
 0x1b5   : > { %v566_v31 = vmin.f32 %v550_v27, 0.999999  ;;  %vm531_vm9 = vcmp.gt.f32.partialorder %v476_v24, 0.24  ;;  %vm533_vm10 = vcmp.gt.f32.partialorder %v486_v30, 0.24 }
 0x1b6   : > { %904 = vlog2.f32 %v577_v25  ;;  %v580_v0 = vsub.f32 1.0, %v564_v26  ;;  %v547_v32 = vsel %vm531_vm9, %v476_v24, 0.0  ;;  %v549_v33 = vsel %vm533_vm10, %v486_v30, 0.0  ;;  %v804_v36 = vpop.f32.mrf.mxu1 }
 0x1b7   : > { %v563_v37 = vmin.f32 %v547_v32, 0.999999  ;;  %v565_v38 = vmin.f32 %v549_v33, 0.999999  ;;  %vm536_vm11 = vcmp.gt.f32.partialorder %v804_v36, 0.24 }
 0x1b8   : > { %v496_v1 = vpop.f32.mrf.mxu1  ;;  %v552_v42 = vsel %vm536_vm11, %v804_v36, 0.0  ;;  %906 = vlog2.f32 %v580_v0  ;;  %v582_v43 = vsub.f32 1.0, %v566_v31 }
 0x1b9   : > { %v579_v2 = vsub.f32 1.0, %v563_v37  ;;  %v581_v39 = vsub.f32 1.0, %v565_v38  ;;  %v895_v6 = vpop.eup %894  ;;  %vm535_vm12 = vcmp.gt.f32.partialorder %v496_v1, 0.24  ;;  %v568_v46 = vmin.f32 %v552_v42, 0.999999 }
 0x1ba   : > { %v807_v44 = vpop.f32.mrf.mxu1  ;;  %v551_v8 = vsel %vm535_vm12, %v496_v1, 0.0  ;;  %v592_v16 = vmul.f32 0.6931472, %v895_v6 }
 0x1bb   : > { %v897_v45 = vpop.eup %896  ;;  %908 = vlog2.f32 %v579_v2  ;;  %vm538_vm13 = vcmp.gt.f32.partialorder %v807_v44, 0.24  ;;  %v567_v9 = vmin.f32 %v551_v8, 0.999999  ;;  %v584_v22 = vsub.f32 1.0, %v568_v46 }
 0x1bc   : > { %v590_v47 = vmul.f32 0.6931472, %v897_v45  ;;  %v506_v48 = vpop.f32.mrf.mxu1  ;;  %910 = vlog2.f32 %v581_v39  ;;  %v554_v49 = vsel %vm538_vm13, %v807_v44, 0.0 }
 0x1bd   : > { %vm537_vm14 = vcmp.gt.f32.partialorder %v506_v48, 0.24  ;;  %v899_v50 = vpop.eup %898  ;;  %912 = vlog2.f32 %v582_v43  ;;  %v583_v51 = vsub.f32 1.0, %v567_v9  ;;  %v570_v23 = vmin.f32 %v554_v49, 0.999999 }
 0x1be   : > { %v810_v17 = vpop.f32.mrf.mxu1  ;;  %v553_v53 = vsel %vm537_vm14, %v506_v48, 0.0  ;;  %v621_v54 = vadd.f32 %v592_v16, %v590_v47  ;;  %v596_v34 = vmul.f32 0.6931472, %v899_v50 }
 0x1bf   : > { %v901_v52 = vpop.eup %900  ;;  %vm540_vm15 = vcmp.gt.f32.partialorder %v810_v17, 0.24  ;;  %v569_v28 = vmin.f32 %v553_v53, 0.999999  ;;  %914 = vlog2.f32 %v583_v51  ;;  %v586_v61 = vsub.f32 1.0, %v570_v23 }
 0x1c0   : > { %v594_v55 = vmul.f32 0.6931472, %v901_v52  ;;  %v556_v29 = vsel %vm540_vm15, %v810_v17, 0.0  ;;  %v516_v56 = vpop.f32.mrf.mxu1  ;;  %916 = vlog2.f32 %v584_v22 }
 0x1c1   : > { %vm539_vm0 = vcmp.gt.f32.partialorder %v516_v56, 0.24  ;;  %v903_v57 = vpop.eup %902  ;;  %v585_v35 = vsub.f32 1.0, %v569_v28  ;;  %v572_v62 = vmin.f32 %v556_v29, 0.999999 }
 0x1c2   : > { %v622_v58 = vadd.f32 %v621_v54, %v594_v55  ;;  %v555_v59 = vsel %vm539_vm0, %v516_v56, 0.0  ;;  %v600_v4 = vmul.f32 0.6931472, %v903_v57 }
 0x1c3   : > { %v905_v60 = vpop.eup %904  ;;  %v571_v63 = vmin.f32 %v555_v59, 0.999999  ;;  %918 = vlog2.f32 %v585_v35  ;;  %v588_v10 = vsub.f32 1.0, %v572_v62 }
 0x1c4   : > { %v598_v40 = vmul.f32 0.6931472, %v905_v60  ;;  %v623_v3 = vadd.f32 %v622_v58, %v596_v34  ;;  %920 = vlog2.f32 %v586_v61 }
 0x1c5   : > { %v587_v41 = vsub.f32 1.0, %v571_v63  ;;  %v907_v7 = vpop.eup %906 }
 0x1c6   : > { %v624_v5 = vadd.f32 %v623_v3, %v598_v40  ;;  %v604_v18 = vmul.f32 0.6931472, %v907_v7 }
 0x1c7   : > { %922 = vlog2.f32 %v587_v41 }
 0x1c8   : > { %v909_v11 = vpop.eup %908  ;;  %v625_v12 = vadd.f32 %v624_v5, %v600_v4  ;;  %924 = vlog2.f32 %v588_v10 }
 0x1c9   : > { %v602_v13 = vmul.f32 0.6931472, %v909_v11  ;;  %v911_v14 = vpop.eup %910 }
 0x1ca   : > { %v913_v15 = vpop.eup %912  ;;  %v606_v21 = vmul.f32 0.6931472, %v911_v14 }
 0x1cb   : > { %v626_v19 = vadd.f32 %v625_v12, %v602_v13  ;;  %v608_v25 = vmul.f32 0.6931472, %v913_v15 }
 0x1cc   : > { %v915_v24 = vpop.eup %914 }
 0x1cd   : > { %v627_v20 = vadd.f32 %v626_v19, %v604_v18  ;;  %v917_v27 = vpop.eup %916  ;;  %v610_v30 = vmul.f32 0.6931472, %v915_v24 }
 0x1ce   : > { %v612_v32 = vmul.f32 0.6931472, %v917_v27 }
 0x1cf   : > { %v628_v26 = vadd.f32 %v627_v20, %v606_v21 }
 0x1d0   : > { %v919_v0 = vpop.eup %918 }
 0x1d1   : > { %v629_v31 = vadd.f32 %v628_v26, %v608_v25  ;;  %v921_v36 = vpop.eup %920  ;;  %v614_v37 = vmul.f32 0.6931472, %v919_v0 }
 0x1d2   : > { %v616_v2 = vmul.f32 0.6931472, %v921_v36 }
 0x1d3   : > { %v630_v33 = vadd.f32 %v629_v31, %v610_v30 }
 0x1d4   : > { %v923_v1 = vpop.eup %922 }
 0x1d5   : > { %v631_v38 = vadd.f32 %v630_v33, %v612_v32  ;;  %v925_v42 = vpop.eup %924  ;;  %v618_v6 = vmul.f32 0.6931472, %v923_v1 }
 0x1d6   : > { %v620_v44 = vmul.f32 0.6931472, %v925_v42 }
 0x1d7   : > { %v632_v39 = vadd.f32 %v631_v38, %v614_v37 }
 0x1d9   : > { %v633_v43 = vadd.f32 %v632_v39, %v616_v2 }
 0x1db   : > { %v634_v45 = vadd.f32 %v633_v43, %v618_v6 }
 0x1dd   : > { %v635_v46 = vadd.f32 %v634_v45, %v620_v44 }
 0x1df   : > { %v636_v8 = vrot.slane %v635_v46, 4 }
 0x1e1   : > { %v637_v47 = vadd.f32 %v636_v8, %v635_v46 }
 0x1e3   : > { %v638_v9 = vrot.slane %v637_v47, 2 }
 0x1e5   : > { %v639_v48 = vadd.f32 %v638_v9, %v637_v47 }
 0x1e7   : > { %v640_v49 = vrot.slane %v639_v48, 1 }
 0x1e9   : > { %v641_v50 = vadd.f32 %v640_v49, %v639_v48 }
 0x1eb   : > { %v642_v16 = vsub.f32 0.0, %v641_v50 }
 0x1ed   : > { %643 = vst [vmem:[%s1136_s28] sm:$0x1] %v642_v16 }
 0x1ee PF: > { %p754_p0 = scmp.ne.s32.totalorder %s1122_s20, 0 }
 0x1f0   : > { %647 = sbr.rel (%p754_p0) target bundleno = 503 (0x1f7), region = 36 }
 0x1f5   : > { %v1029_v51 = vmov 0.0  }
 0x1f6   : > { %648 = vst [vmem:[%s1136_s28] sm:$0x1] %v1029_v51 }
 0x1f7 PF: > { %s755_s29 = sshll.u32 %s1091_s9, 4  ;;  %s662_s13 = sshll.u32 %s1136_s28, 4  ;;  %s663_s13 = int_to_ptr.vmem [resolvable:$true] %s662_s13 }
 0x1f8   : > { %s660_s12 = scalar_lea.hbm %s1313_s5, %s755_s29  ;;  %s650_s18 = scalar_lea.sflag [#allocation7], %s177_s17 }
 0x1f9   : > { %s962_s19 = scalar_lea.vmem %s663_s13, 16  ;;  %s1030_s20 = smov [#allocation6]  }
 0x1fa   : > { %p963_p1 = scmp.ne.s32.totalorder %s663_s13, %s962_s19  ;;  %s966_s21 = sshll.u32 %s1030_s20, 4  ;;  %s967_s21 = int_to_ptr.vmem [resolvable:$false] %s966_s21 }
 0x1fb   : > { %s968_s22 = scalar_lea.vmem %s967_s21, 32  ;;  %p969_p4 = scmp.lt.s32.totalorder %s663_s13, %s967_s21 }
 0x1fc   : > { %p964_p2 = pnand %p963_p1, %p1108_p6  ;;  %p970_p5 = scmp.lt.s32.totalorder %s968_s22, %s962_s19 }
 0x1fe   : > { %p965_p3 = pneg %p964_p2  ;;  %p971_p8 = por %p970_p5, %p969_p4 }
 0x200   : > { %p972_p9 = pnand %p971_p8, %p965_p3 }
 0x202   : > { %975 = shalt.err (!%p972_p9)
}
 0x203   : > { %s976_s9 = scalar_lea.hbm %s660_s12, 16  ;;  %s980_s24 = scalar_lea.hbm %s1313_s5, 80 }
 0x204   : > { %p977_p10 = scmp.ne.s32.totalorder %s660_s12, %s976_s9  ;;  %p981_p13 = scmp.lt.s32.totalorder %s660_s12, %s1313_s5 }
 0x205   : > { %p982_p0 = scmp.lt.s32.totalorder %s980_s24, %s976_s9 }
 0x206   : > { %p978_p11 = pnand %p977_p10, %p1108_p6 }
 0x207   : > { %p983_p1 = por %p982_p0, %p981_p13 }
 0x208   : > { %p979_p12 = pneg %p978_p11 }
 0x20a   : > { %p984_p2 = pnand %p983_p1, %p979_p12 }
 0x20c   : > { %987 = shalt.err (!%p984_p2)
}
 0x20d   : > { %819 = dma.vmem_to_hbm [thread:$0]  (%p1108_p6), %s663_s13, 16, %s660_s12, %s650_s18  }
 0x20e PF: > { %p825_p3 = scmp.ge.s32.totalorder %s1024_s8, 2  ;;  %s674_s0 = sand.u32 1, %s1012_s6  }
 0x20f   : > { %s675_s1 = scalar_lea.sflag [#allocation7], %s674_s0 }
 0x210   : > { %p822_p4 = pnand %p825_p3, %p1112_p7 }
 0x212   : > { %p823_p5 = pneg %p822_p4 }
 0x214   : > { %1007 = dma.done.wait (%p823_p5), %s675_s1, 16  }
 0x215   : > { %1009 = vsyncadd (%p823_p5), %s675_s1, 4294967280  ;;  %p29_p8 = scmp.ge.s32.totalorder %s1095_s11, 7   ;;  %s1318_s6 = smov %s1016_s7 }
 0x216   : > { %s1319_s7 = smov %s1020_s2  ;;  %s1320_s2 = smov %s1106_s14 }
 0x217   : > { %s1321_s8 = smov %s1095_s11  ;;  %31 = sbr.rel (!%p29_p8) target bundleno = 38 (0x26), region = 74 }
 0x21c   :  { %679 = vsyncpa [#allocation7], 1 }
 0x21d   :  { %681 = vsyncpa [#allocation7 + $0x1], 1 }

</bundles_post_ra>
